<compile_context>
chip_gen: v6e
topology: v6e:2x2x1
jax: 0.10.0
libtpu: 0.0.40
codegen_flags: <defaults>
</compile_context>

<pallas_src>
import jax
import jax.numpy as jnp
import numpy as np
from jax.experimental import pallas as pl
from jax.experimental.pallas import tpu as pltpu


# ---------------------------------------------------------------------------
# BlockSpec index maps (module level).
# ---------------------------------------------------------------------------
def _rep_idx(n, i):
    # (w, W) replication matrix: same block for every grid step (stays resident)
    return (0, 0)


def _tile_idx(n, i):
    # sample n, full C, row-tile i, full width
    return (n, 0, i, 0)


# ---------------------------------------------------------------------------
# Kernel: one (sample, source-row-tile) step, (C, th, w) -> (C, th*sh, W).
# ---------------------------------------------------------------------------
def _nearest_upsample_kernel(rep_ref, x_ref, o_ref):
    c, th = x_ref.shape[1], x_ref.shape[2]
    sh = o_ref.shape[2] // th
    w_out = o_ref.shape[3]
    rep = rep_ref[...]                                        # (w, W) one-hot f32
    for t in range(th):                                       # static, unrolled
        row = x_ref[0, :, t, :].astype(jnp.float32)           # (C, w)
        up = jnp.dot(row, rep, preferred_element_type=jnp.float32)   # (C, W)
        # H replication: sublane broadcast into sh consecutive output rows.
        o_ref[0, :, pl.ds(t * sh, sh), :] = jnp.broadcast_to(
            up[:, None, :], (c, sh, w_out)).astype(o_ref.dtype)


def _pick_source_row_tile(h, sh, c, w, w_out, itemsize,
                          vmem_budget=8 << 20, max_unroll=32):
    """Largest source-row tile that divides h, keeps (8,128)-friendly block
    shapes (multiple of 8 or the full extent) and fits a conservative VMEM
    budget (double-buffered input + output tiles)."""
    def tile_bytes(th):
        return 2 * itemsize * (c * th * w + c * th * sh * w_out)
    cands = [th for th in range(8, min(h, max_unroll) + 1, 8) if h % th == 0]
    if h <= max_unroll or not cands:
        cands.append(h)
    fitting = [th for th in cands if tile_bytes(th) <= vmem_budget]
    return max(fitting) if fitting else min(cands)


# ---------------------------------------------------------------------------
# AbstractUpsampling.forward
# ---------------------------------------------------------------------------
def abstract_upsampling_forward(encoder_features, x):
    """Nearest-neighbour upsample of `x` (NCHW) to `encoder_features`'s spatial
    size -- the literal AbstractUpsampling/InterpolateUpsampling forward."""
    if x.ndim != 4 or encoder_features.ndim != 4:
        raise NotImplementedError("4-D (NCHW) tensors only")
    n, c, h, w = x.shape
    h_out = int(encoder_features.shape[2])
    w_out = int(encoder_features.shape[3])
    if h_out == h and w_out == w:
        return x
    if h_out % h:
        # TODO(synk): PyTorch float-scale 'nearest' rounding for non-integer H
        # ratios (needs a per-output-row source-row table via scalar prefetch).
        raise NotImplementedError("only integer nearest upsample factors along H")
    sh = h_out // h

    # Exact nearest column map src = floor(dst * w / W) as a one-hot (w, W)
    # replication matrix (handles non-integer W ratios as well).
    src_col = (np.arange(w_out) * w) // w_out
    rep = jnp.asarray(src_col[None, :] == np.arange(w)[:, None],
                      dtype=jnp.float32)                              # (w, W)

    th = _pick_source_row_tile(h, sh, c, w, w_out, np.dtype(x.dtype).itemsize)

    return pl.pallas_call(
        _nearest_upsample_kernel,
        out_shape=jax.ShapeDtypeStruct((n, c, h_out, w_out), x.dtype),
        grid=(n, h // th),
        in_specs=[
            pl.BlockSpec((w, w_out), _rep_idx),
            pl.BlockSpec((1, c, th, w), _tile_idx),
        ],
        out_specs=pl.BlockSpec((1, c, th * sh, w_out), _tile_idx),
        compiler_params=pltpu.CompilerParams(
            dimension_semantics=("parallel", "parallel")),
    )(rep, x)


# ---------------------------------------------------------------------------
# Pure-numpy reference (PyTorch 'nearest': src = floor(dst * in / out)).
# ---------------------------------------------------------------------------
def _ref_nearest(enc, x):
    H, W = enc.shape[2], enc.shape[3]
    h, w = x.shape[2], x.shape[3]
    ih = (np.arange(H) * h) // H
    iw = (np.arange(W) * w) // W
    return np.asarray(x)[:, :, ih, :][:, :, :, iw]


if __name__ == "__main__":
    key = jax.random.PRNGKey(0)
    k1, k2, k3, k4 = jax.random.split(key, 4)

    fwd = jax.jit(abstract_upsampling_forward)

    # (1) 2x nearest upsample: x (2, 8, 8, 8) -> encoder spatial (16, 16)
    enc = jax.random.normal(k1, (2, 4, 16, 16), jnp.float32)
    x = jax.random.normal(k2, (2, 8, 8, 8), jnp.float32)
    out = jax.block_until_ready(fwd(enc, x))
    assert out.shape == (2, 8, 16, 16), out.shape
    np.testing.assert_allclose(np.asarray(out), _ref_nearest(enc, x),
                               rtol=0, atol=0)

    # (2) 4x along H, non-integer ratio along W (6 -> 16), bf16 input
    enc2 = jax.random.normal(k3, (2, 4, 16, 16), jnp.float32)
    x2 = jax.random.normal(k4, (2, 8, 4, 6), jnp.float32).astype(jnp.bfloat16)
    out2 = jax.block_until_ready(fwd(enc2, x2))
    assert out2.shape == (2, 8, 16, 16), out2.shape
    np.testing.assert_allclose(
        np.asarray(out2.astype(jnp.float32)),
        _ref_nearest(enc2, x2).astype(np.float32),
        rtol=0, atol=0)

    print("KERNEL_OK")
</pallas_src>

<mosaic_0001>
module attributes {stable_mosaic.version = 11 : i64} {
  func.func @_nearest_upsample_kernel(%arg0: i32, %arg1: i32, %arg2: memref<8x16xf32, #tpu.memory_space<vmem>>, %arg3: memref<1x8x8x8xf32, #tpu.memory_space<vmem>>, %arg4: memref<1x8x16x16xf32, #tpu.memory_space<vmem>>) attributes {dimension_semantics = [#tpu.dimension_semantics<parallel>, #tpu.dimension_semantics<parallel>], iteration_bounds = array<i64: 2, 1>, scalar_prefetch = 0 : i64, scratch_operands = 0 : i64, tpu.core_type = #tpu.core_type<tc>, window_params = [{pipeline_mode = #tpu.pipeline_mode<synchronous>, transform_indices = @transform_0, window_bounds = array<i64: 8, 16>}, {transform_indices = @transform_1, window_bounds = array<i64: 1, 8, 8, 8>}, {transform_indices = @transform_2, window_bounds = array<i64: 1, 8, 16, 16>}]} {
    %c0 = arith.constant 0 : index
    %c0_0 = arith.constant 0 : index
    %0 = vector.load %arg2[%c0, %c0_0] : memref<8x16xf32, #tpu.memory_space<vmem>>, vector<8x16xf32>
    %c0_1 = arith.constant 0 : index
    %c0_2 = arith.constant 0 : index
    %c0_3 = arith.constant 0 : index
    %c0_4 = arith.constant 0 : index
    %1 = vector.load %arg3[%c0_1, %c0_2, %c0_3, %c0_4] : memref<1x8x8x8xf32, #tpu.memory_space<vmem>>, vector<1x8x1x8xf32>
    %2 = vector.shape_cast %1 : vector<1x8x1x8xf32> to vector<8x8xf32>
    %cst = arith.constant dense<0.000000e+00> : vector<8x16xf32>
    %3 = tpu.matmul %2, %0, %cst {dimension_numbers = #tpu.dot_dimension_numbers<[1], [0], [0], [1], [0, 0, 1, 1], [], []>} : vector<8x8xf32>, vector<8x16xf32>, vector<8x16xf32> -> vector<8x16xf32>
    %4 = vector.shape_cast %3 : vector<8x16xf32> to vector<8x1x16xf32>
    %5 = vector.shape_cast %4 : vector<8x1x16xf32> to vector<8x1x16xf32>
    %6 = vector.broadcast %5 : vector<8x1x16xf32> to vector<8x2x16xf32>
    %c0_5 = arith.constant 0 : index
    %c0_6 = arith.constant 0 : index
    %c0_7 = arith.constant 0 : index
    %c0_8 = arith.constant 0 : index
    %7 = vector.load %arg4[%c0_5, %c0_6, %c0_7, %c0_8] : memref<1x8x16x16xf32, #tpu.memory_space<vmem>>, vector<1x8x2x16xf32>
    %8 = vector.shape_cast %7 : vector<1x8x2x16xf32> to vector<8x2x16xf32>
    %9 = vector.shape_cast %6 : vector<8x2x16xf32> to vector<1x8x2x16xf32>
    tpu.vector_store %arg4[%c0_5, %c0_6, %c0_7, %c0_8], %9 {strides = array<i32>} : memref<1x8x16x16xf32, #tpu.memory_space<vmem>>, vector<1x8x2x16xf32>,
    %c0_9 = arith.constant 0 : index
    %c0_10 = arith.constant 0 : index
    %c1 = arith.constant 1 : index
    %c0_11 = arith.constant 0 : index
    %10 = vector.load %arg3[%c0_9, %c0_10, %c1, %c0_11] : memref<1x8x8x8xf32, #tpu.memory_space<vmem>>, vector<1x8x1x8xf32>
    %11 = vector.shape_cast %10 : vector<1x8x1x8xf32> to vector<8x8xf32>
    %cst_12 = arith.constant dense<0.000000e+00> : vector<8x16xf32>
    %12 = tpu.matmul %11, %0, %cst_12 {dimension_numbers = #tpu.dot_dimension_numbers<[1], [0], [0], [1], [0, 0, 1, 1], [], []>} : vector<8x8xf32>, vector<8x16xf32>, vector<8x16xf32> -> vector<8x16xf32>
    %13 = vector.shape_cast %12 : vector<8x16xf32> to vector<8x1x16xf32>
    %14 = vector.shape_cast %13 : vector<8x1x16xf32> to vector<8x1x16xf32>
    %15 = vector.broadcast %14 : vector<8x1x16xf32> to vector<8x2x16xf32>
    %c0_13 = arith.constant 0 : index
    %c0_14 = arith.constant 0 : index
    %c2 = arith.constant 2 : index
    %c0_15 = arith.constant 0 : index
    %16 = vector.load %arg4[%c0_13, %c0_14, %c2, %c0_15] : memref<1x8x16x16xf32, #tpu.memory_space<vmem>>, vector<1x8x2x16xf32>
    %17 = vector.shape_cast %16 : vector<1x8x2x16xf32> to vector<8x2x16xf32>
    %18 = vector.shape_cast %15 : vector<8x2x16xf32> to vector<1x8x2x16xf32>
    tpu.vector_store %arg4[%c0_13, %c0_14, %c2, %c0_15], %18 {strides = array<i32>} : memref<1x8x16x16xf32, #tpu.memory_space<vmem>>, vector<1x8x2x16xf32>,
    %c0_16 = arith.constant 0 : index
    %c0_17 = arith.constant 0 : index
    %c2_18 = arith.constant 2 : index
    %c0_19 = arith.constant 0 : index
    %19 = vector.load %arg3[%c0_16, %c0_17, %c2_18, %c0_19] : memref<1x8x8x8xf32, #tpu.memory_space<vmem>>, vector<1x8x1x8xf32>
    %20 = vector.shape_cast %19 : vector<1x8x1x8xf32> to vector<8x8xf32>
    %cst_20 = arith.constant dense<0.000000e+00> : vector<8x16xf32>
    %21 = tpu.matmul %20, %0, %cst_20 {dimension_numbers = #tpu.dot_dimension_numbers<[1], [0], [0], [1], [0, 0, 1, 1], [], []>} : vector<8x8xf32>, vector<8x16xf32>, vector<8x16xf32> -> vector<8x16xf32>
    %22 = vector.shape_cast %21 : vector<8x16xf32> to vector<8x1x16xf32>
    %23 = vector.shape_cast %22 : vector<8x1x16xf32> to vector<8x1x16xf32>
    %24 = vector.broadcast %23 : vector<8x1x16xf32> to vector<8x2x16xf32>
    %c0_21 = arith.constant 0 : index
    %c0_22 = arith.constant 0 : index
    %c4 = arith.constant 4 : index
    %c0_23 = arith.constant 0 : index
    %25 = vector.load %arg4[%c0_21, %c0_22, %c4, %c0_23] : memref<1x8x16x16xf32, #tpu.memory_space<vmem>>, vector<1x8x2x16xf32>
    %26 = vector.shape_cast %25 : vector<1x8x2x16xf32> to vector<8x2x16xf32>
    %27 = vector.shape_cast %24 : vector<8x2x16xf32> to vector<1x8x2x16xf32>
    tpu.vector_store %arg4[%c0_21, %c0_22, %c4, %c0_23], %27 {strides = array<i32>} : memref<1x8x16x16xf32, #tpu.memory_space<vmem>>, vector<1x8x2x16xf32>,
    %c0_24 = arith.constant 0 : index
    %c0_25 = arith.constant 0 : index
    %c3 = arith.constant 3 : index
    %c0_26 = arith.constant 0 : index
    %28 = vector.load %arg3[%c0_24, %c0_25, %c3, %c0_26] : memref<1x8x8x8xf32, #tpu.memory_space<vmem>>, vector<1x8x1x8xf32>
    %29 = vector.shape_cast %28 : vector<1x8x1x8xf32> to vector<8x8xf32>
    %cst_27 = arith.constant dense<0.000000e+00> : vector<8x16xf32>
    %30 = tpu.matmul %29, %0, %cst_27 {dimension_numbers = #tpu.dot_dimension_numbers<[1], [0], [0], [1], [0, 0, 1, 1], [], []>} : vector<8x8xf32>, vector<8x16xf32>, vector<8x16xf32> -> vector<8x16xf32>
    %31 = vector.shape_cast %30 : vector<8x16xf32> to vector<8x1x16xf32>
    %32 = vector.shape_cast %31 : vector<8x1x16xf32> to vector<8x1x16xf32>
    %33 = vector.broadcast %32 : vector<8x1x16xf32> to vector<8x2x16xf32>
    %c0_28 = arith.constant 0 : index
    %c0_29 = arith.constant 0 : index
    %c6 = arith.constant 6 : index
    %c0_30 = arith.constant 0 : index
    %34 = vector.load %arg4[%c0_28, %c0_29, %c6, %c0_30] : memref<1x8x16x16xf32, #tpu.memory_space<vmem>>, vector<1x8x2x16xf32>
    %35 = vector.shape_cast %34 : vector<1x8x2x16xf32> to vector<8x2x16xf32>
    %36 = vector.shape_cast %33 : vector<8x2x16xf32> to vector<1x8x2x16xf32>
    tpu.vector_store %arg4[%c0_28, %c0_29, %c6, %c0_30], %36 {strides = array<i32>} : memref<1x8x16x16xf32, #tpu.memory_space<vmem>>, vector<1x8x2x16xf32>,
    %c0_31 = arith.constant 0 : index
    %c0_32 = arith.constant 0 : index
    %c4_33 = arith.constant 4 : index
    %c0_34 = arith.constant 0 : index
    %37 = vector.load %arg3[%c0_31, %c0_32, %c4_33, %c0_34] : memref<1x8x8x8xf32, #tpu.memory_space<vmem>>, vector<1x8x1x8xf32>
    %38 = vector.shape_cast %37 : vector<1x8x1x8xf32> to vector<8x8xf32>
    %cst_35 = arith.constant dense<0.000000e+00> : vector<8x16xf32>
    %39 = tpu.matmul %38, %0, %cst_35 {dimension_numbers = #tpu.dot_dimension_numbers<[1], [0], [0], [1], [0, 0, 1, 1], [], []>} : vector<8x8xf32>, vector<8x16xf32>, vector<8x16xf32> -> vector<8x16xf32>
    %40 = vector.shape_cast %39 : vector<8x16xf32> to vector<8x1x16xf32>
    %41 = vector.shape_cast %40 : vector<8x1x16xf32> to vector<8x1x16xf32>
    %42 = vector.broadcast %41 : vector<8x1x16xf32> to vector<8x2x16xf32>
    %c0_36 = arith.constant 0 : index
    %c0_37 = arith.constant 0 : index
    %c8 = arith.constant 8 : index
    %c0_38 = arith.constant 0 : index
    %43 = vector.load %arg4[%c0_36, %c0_37, %c8, %c0_38] : memref<1x8x16x16xf32, #tpu.memory_space<vmem>>, vector<1x8x2x16xf32>
    %44 = vector.shape_cast %43 : vector<1x8x2x16xf32> to vector<8x2x16xf32>
    %45 = vector.shape_cast %42 : vector<8x2x16xf32> to vector<1x8x2x16xf32>
    tpu.vector_store %arg4[%c0_36, %c0_37, %c8, %c0_38], %45 {strides = array<i32>} : memref<1x8x16x16xf32, #tpu.memory_space<vmem>>, vector<1x8x2x16xf32>,
    %c0_39 = arith.constant 0 : index
    %c0_40 = arith.constant 0 : index
    %c5 = arith.constant 5 : index
    %c0_41 = arith.constant 0 : index
    %46 = vector.load %arg3[%c0_39, %c0_40, %c5, %c0_41] : memref<1x8x8x8xf32, #tpu.memory_space<vmem>>, vector<1x8x1x8xf32>
    %47 = vector.shape_cast %46 : vector<1x8x1x8xf32> to vector<8x8xf32>
    %cst_42 = arith.constant dense<0.000000e+00> : vector<8x16xf32>
    %48 = tpu.matmul %47, %0, %cst_42 {dimension_numbers = #tpu.dot_dimension_numbers<[1], [0], [0], [1], [0, 0, 1, 1], [], []>} : vector<8x8xf32>, vector<8x16xf32>, vector<8x16xf32> -> vector<8x16xf32>
    %49 = vector.shape_cast %48 : vector<8x16xf32> to vector<8x1x16xf32>
    %50 = vector.shape_cast %49 : vector<8x1x16xf32> to vector<8x1x16xf32>
    %51 = vector.broadcast %50 : vector<8x1x16xf32> to vector<8x2x16xf32>
    %c0_43 = arith.constant 0 : index
    %c0_44 = arith.constant 0 : index
    %c10 = arith.constant 10 : index
    %c0_45 = arith.constant 0 : index
    %52 = vector.load %arg4[%c0_43, %c0_44, %c10, %c0_45] : memref<1x8x16x16xf32, #tpu.memory_space<vmem>>, vector<1x8x2x16xf32>
    %53 = vector.shape_cast %52 : vector<1x8x2x16xf32> to vector<8x2x16xf32>
    %54 = vector.shape_cast %51 : vector<8x2x16xf32> to vector<1x8x2x16xf32>
    tpu.vector_store %arg4[%c0_43, %c0_44, %c10, %c0_45], %54 {strides = array<i32>} : memref<1x8x16x16xf32, #tpu.memory_space<vmem>>, vector<1x8x2x16xf32>,
    %c0_46 = arith.constant 0 : index
    %c0_47 = arith.constant 0 : index
    %c6_48 = arith.constant 6 : index
    %c0_49 = arith.constant 0 : index
    %55 = vector.load %arg3[%c0_46, %c0_47, %c6_48, %c0_49] : memref<1x8x8x8xf32, #tpu.memory_space<vmem>>, vector<1x8x1x8xf32>
    %56 = vector.shape_cast %55 : vector<1x8x1x8xf32> to vector<8x8xf32>
    %cst_50 = arith.constant dense<0.000000e+00> : vector<8x16xf32>
    %57 = tpu.matmul %56, %0, %cst_50 {dimension_numbers = #tpu.dot_dimension_numbers<[1], [0], [0], [1], [0, 0, 1, 1], [], []>} : vector<8x8xf32>, vector<8x16xf32>, vector<8x16xf32> -> vector<8x16xf32>
    %58 = vector.shape_cast %57 : vector<8x16xf32> to vector<8x1x16xf32>
    %59 = vector.shape_cast %58 : vector<8x1x16xf32> to vector<8x1x16xf32>
    %60 = vector.broadcast %59 : vector<8x1x16xf32> to vector<8x2x16xf32>
    %c0_51 = arith.constant 0 : index
    %c0_52 = arith.constant 0 : index
    %c12 = arith.constant 12 : index
    %c0_53 = arith.constant 0 : index
    %61 = vector.load %arg4[%c0_51, %c0_52, %c12, %c0_53] : memref<1x8x16x16xf32, #tpu.memory_space<vmem>>, vector<1x8x2x16xf32>
    %62 = vector.shape_cast %61 : vector<1x8x2x16xf32> to vector<8x2x16xf32>
    %63 = vector.shape_cast %60 : vector<8x2x16xf32> to vector<1x8x2x16xf32>
    tpu.vector_store %arg4[%c0_51, %c0_52, %c12, %c0_53], %63 {strides = array<i32>} : memref<1x8x16x16xf32, #tpu.memory_space<vmem>>, vector<1x8x2x16xf32>,
    %c0_54 = arith.constant 0 : index
    %c0_55 = arith.constant 0 : index
    %c7 = arith.constant 7 : index
    %c0_56 = arith.constant 0 : index
    %64 = vector.load %arg3[%c0_54, %c0_55, %c7, %c0_56] : memref<1x8x8x8xf32, #tpu.memory_space<vmem>>, vector<1x8x1x8xf32>
    %65 = vector.shape_cast %64 : vector<1x8x1x8xf32> to vector<8x8xf32>
    %cst_57 = arith.constant dense<0.000000e+00> : vector<8x16xf32>
    %66 = tpu.matmul %65, %0, %cst_57 {dimension_numbers = #tpu.dot_dimension_numbers<[1], [0], [0], [1], [0, 0, 1, 1], [], []>} : vector<8x8xf32>, vector<8x16xf32>, vector<8x16xf32> -> vector<8x16xf32>
    %67 = vector.shape_cast %66 : vector<8x16xf32> to vector<8x1x16xf32>
    %68 = vector.shape_cast %67 : vector<8x1x16xf32> to vector<8x1x16xf32>
    %69 = vector.broadcast %68 : vector<8x1x16xf32> to vector<8x2x16xf32>
    %c0_58 = arith.constant 0 : index
    %c0_59 = arith.constant 0 : index
    %c14 = arith.constant 14 : index
    %c0_60 = arith.constant 0 : index
    %70 = vector.load %arg4[%c0_58, %c0_59, %c14, %c0_60] : memref<1x8x16x16xf32, #tpu.memory_space<vmem>>, vector<1x8x2x16xf32>
    %71 = vector.shape_cast %70 : vector<1x8x2x16xf32> to vector<8x2x16xf32>
    %72 = vector.shape_cast %69 : vector<8x2x16xf32> to vector<1x8x2x16xf32>
    tpu.vector_store %arg4[%c0_58, %c0_59, %c14, %c0_60], %72 {strides = array<i32>} : memref<1x8x16x16xf32, #tpu.memory_space<vmem>>, vector<1x8x2x16xf32>,
    return
  }
  func.func @transform_0(%arg0: i32, %arg1: i32) -> (i32, i32) {
    %c0_i32 = arith.constant 0 : i32
    %c0_i32_0 = arith.constant 0 : i32
    %c0_i32_1 = arith.constant 0 : i32
    return %c0_i32, %c0_i32_0 : i32, i32
  }
  func.func @transform_1(%arg0: i32, %arg1: i32) -> (i32, i32, i32, i32) {
    %c0_i32 = arith.constant 0 : i32
    %c0_i32_0 = arith.constant 0 : i32
    %c0_i32_1 = arith.constant 0 : i32
    return %arg0, %c0_i32, %arg1, %c0_i32_0 : i32, i32, i32, i32
  }
  func.func @transform_2(%arg0: i32, %arg1: i32) -> (i32, i32, i32, i32) {
    %c0_i32 = arith.constant 0 : i32
    %c0_i32_0 = arith.constant 0 : i32
    %c0_i32_1 = arith.constant 0 : i32
    return %arg0, %c0_i32, %arg1, %c0_i32_0 : i32, i32, i32, i32
  }
}

</mosaic_0001>

<bundles_post_ra>
// kernel: abstract_upsampling_forward.1
= control target key start
LH: loop header
LB: loop body
LE: loop exit
PB: predicated region body
PF: predicated region fallthrough
CT: control target
= control target key end

     0   :  { %7 = vsyncpa [#allocation3], 0  ;;  %s2839_s0 = inlined_call_operand.hbm [shape: f32[8,16], index: 0, kind: input, shape index: {}]   ;;  %s2840_s1 = inlined_call_operand.hbm [shape: f32[2,8,8,8], index: 1, kind: input, shape index: {}]   ;;  %s2841_s2 = inlined_call_operand.hbm [shape: f32[2,8,16,16], index: 2, kind: output, shape index: {}]  }
   0x1   :  { %8 = vsyncpa [#allocation6], 0 }
   0x2   :  { %10 = vsyncpa [#allocation6 + $0x1], 0 }
   0x3   :  { %11 = vsyncpa [#allocation4], 0 }
   0x4   :  { %13 = vsyncpa [#allocation4 + $0x1], 0  ;;  %s2245_s9 = smov 0   ;;  %s2247_s10 = smov 0  }
   0x5   :  { %s2249_s11 = smov 0   ;;  %s2251_s12 = smov 0  }
   0x6   :  { %s2253_s13 = smov 0   ;;  %s2255_s14 = smov 0  }
   0x7 LB: > { %s1917_s15 = sadd.s32 4294967295, %s2218_s14   ;;  %s1918_s16 = sadd.s32 4294967294, %s2218_s14   ;;  %s2218_s14 = sphi %s2255_s14, %s19_s14   ;;  %s2214_s13 = sphi %s2253_s13, %s2860_s13   ;;  %s2210_s12 = sphi %s2251_s12, %s2859_s12   ;;  %s2206_s11 = sphi %s2249_s11, %s2858_s11   ;;  %s2202_s10 = sphi %s2247_s10, %s2857_s10   ;;  %s2198_s9 = sphi %s2245_s9, %s2856_s9  }
   0x8   : > { %s61_s17 = sadd.s32 1, %s2206_s11  ;;  %p68_p0 = scmp.ne.s32.totalorder %s2206_s11, %s2202_s10 }
   0x9   : > { %p69_p1 = scmp.eq.s32.totalorder %s2218_s14, 0  ;;  %p74_p2 = scmp.ne.s32.totalorder %s2202_s10, %s2198_s9 }
   0xa   : > { %p2283_p3 = scmp.eq.s32.totalorder %s1917_s15, 0  ;;  %p100_p4 = scmp.eq.s32.totalorder %s1917_s15, 1 }
   0xb   : > { %p2287_p5 = por %p69_p1, %p68_p0  ;;  %p106_p6 = scmp.eq.s32.totalorder %s1918_s16, 1 }
   0xc   : > { %p2293_p7 = por %p2283_p3, %p74_p2  ;;  %p2297_p8 = por %p100_p4, %p68_p0 }
   0xd   : > { %p2301_p9 = por %p106_p6, %p74_p2  ;;  %p1919_p10 = scmp.ge.s32.totalorder %s2218_s14, 1 }
   0xe   : > { %s2846_s20 = scalar_select %p2293_p7, 1, 0 }
   0xf   : > { %s2847_s21 = scalar_select %p2297_p8, 1, 0 }
  0x10   : > { %s2848_s22 = scalar_select %p2301_p9, 1, 0 }
  0x11   : > { %p113_p11 = scmp.lt.s32.totalorder %s2218_s14, 3  ;;  %s2220_s24 = smov [#allocation2]  }
  0x12   : > { %s126_s25 = sshll.u32 %s2220_s24, 4  ;;  %p2021_p1 = scmp.lt.s32.totalorder %s2218_s14, 2  ;;  %s127_s25 = int_to_ptr.vmem [resolvable:$true] %s126_s25 }
  0x13   : > { %p2308_p13 = pnand %p1919_p10, %p113_p11  ;;  %s31_s28 = sadd.s32 1, %s2214_s13 }
  0x14   : > { %p2317_p4 = pnand %p2021_p1, %p2287_p5  ;;  %p33_p6 = scmp.ge.s32.totalorder %s31_s28, 2 }
  0x15   : > { %p2008_p0 = pneg %p2308_p13  ;;  %s137_s29 = sand.u32 1, %s2206_s11  }
  0x16   : > { %s2091_s30 = scalar_lea.vmem %s127_s25, 128  ;;  %p2099_p8 = scmp.lt.s32.totalorder %s127_s25, %s127_s25 }
  0x17   : > { %p2323_p2 = pnand %p2008_p0, %p2283_p3  ;;  %p2092_p11 = scmp.ne.s32.totalorder %s127_s25, %s2091_s30 }
  0x18   : > { %p2100_p5 = scmp.lt.s32.totalorder %s2091_s30, %s2091_s30 }
  0x19   : > { %p2082_p10 = pneg %p2323_p2 }
  0x1a   : > { %p2101_p1 = por %p2100_p5, %p2099_p8 }
  0x1b   : > { %p2094_p12 = pnand %p2092_p11, %p2082_p10 }
  0x1d   : > { %p2095_p9 = pneg %p2094_p12 }
  0x1f   : > { %p2102_p7 = pnand %p2101_p1, %p2095_p9 }
  0x21   : > { %2105 = shalt.err (!%p2102_p7)
}
  0x22   : > { %2011 = dma.hbm_to_vmem [thread:$0]  (!%p2323_p2), %s2839_s0, 128, %s127_s25, [#allocation3]  }
  0x23   : > { %s2862_s28 = smov (%p33_p6, %s31_s28), 0  ;;  %s1922_s5 = sshll.u32 %s137_s29, 6 }
  0x24   : > { %s56_s6 = ssub.s32 %s2214_s13, %s2862_s28  ;;  %s1942_s7 = sshll.u32 %s2214_s13, 10 }
  0x25   : > { %p59_p12 = scmp.eq.s32.totalorder %s56_s6, 0  ;;  %s148_s16 = scalar_lea.hbm %s2840_s1, %s1942_s7 }
  0x26   : > { %s141_s19 = scalar_lea.vmem [#allocation5], %s1922_s5  ;;  %s138_s30 = scalar_lea.sflag [#allocation6], %s137_s29 }
  0x27   : > { %s149_s24 = sshll.u32 %s141_s19, 4  ;;  %p2108_p7 = pneg %p2317_p4  ;;  %s150_s24 = int_to_ptr.vmem [resolvable:$true] %s149_s24 }
  0x28   : > { %s2347_s27 = scalar_select %p59_p12, %s2206_s11, %s61_s17  }
  0x29   : > { %s2119_s25 = scalar_lea.vmem %s150_s24, 1024  ;;  %s2221_s3 = smov [#allocation5]  }
  0x2a   : > { %p2120_p8 = scmp.ne.s32.totalorder %s150_s24, %s2119_s25  ;;  %s2124_s4 = sshll.u32 %s2221_s3, 4  ;;  %s2125_s4 = int_to_ptr.vmem [resolvable:$false] %s2124_s4 }
  0x2b   : > { %s2126_s6 = scalar_lea.vmem %s2125_s4, 2048  ;;  %p2127_p2 = scmp.lt.s32.totalorder %s150_s24, %s2125_s4 }
  0x2c   : > { %p2122_p9 = pnand %p2120_p8, %p2108_p7  ;;  %p2128_p6 = scmp.lt.s32.totalorder %s2126_s6, %s2119_s25 }
  0x2e   : > { %p2123_p0 = pneg %p2122_p9  ;;  %p2129_p10 = por %p2128_p6, %p2127_p2 }
  0x30   : > { %p2130_p11 = pnand %p2129_p10, %p2123_p0 }
  0x32   : > { %2133 = shalt.err (!%p2130_p11)
}
  0x33   : > { %s2222_s5 = smov 128   ;;  %s2223_s17 = smov 8  }
  0x34   : > { %2015 = dma.hbm_to_vmem [thread:$0]  (!%p2317_p4), %s148_s16, 1024, %s150_s24, %s138_s30, %s2222_s5, %s2222_s5, %s2223_s17  }
  0x35   : > { %161 = sbr.rel (%p2308_p13) target bundleno = 336 (0x150), region = 28 }
  0x3a   : > { %2185 = dma.done.wait (%p2283_p3), [#allocation3], 128  }
  0x3b   : > { %2187 = vsyncadd (%p2283_p3), [#allocation3], 4294967168  ;;  %s2360_s29 = sand.u32 1, %s2202_s10   ;;  %p2852_p4 = scmp.ne.s32.totalorder %s2846_s20, 0 }
  0x3c   : > { %s1927_s7 = sshll.u32 %s2360_s29, 6  ;;  %s168_s8 = scalar_lea.sflag [#allocation6], %s2360_s29 }
  0x3d   : > { %s2364_s15 = scalar_lea.vmem [#allocation5], %s1927_s7 }
  0x3e   : > { %2189 = dma.done.wait (%p2852_p4), %s168_s8, 1024  }
  0x3f   : > { %2191 = vsyncadd (%p2852_p4), %s168_s8, 4294966272  ;;  %v2224_v0 = vmov 0.0   ;;  %vm2225_vm0 = vmmov 0   ;;  %vm211_vm1 = vcmask 1041409   ;;  %vm214_vm2 = vcmask 1042434   ;;  %v2376_v1 = vld [vmem:[#allocation2] sm:$0xff] }
  0x40   : > { %1960 = vmatprep.subr.mxu0 %v2224_v0  ;;  %1965 = vmatprep.subr.mxu1 %v2224_v0  ;;  %vm217_vm3 = vcmask 1043459   ;;  %vm220_vm4 = vcmask 1044484   ;;  %vm223_vm5 = vcmask 1045509   ;;  %vm226_vm6 = vcmask 1046534   ;;  %v194_v2 = vld [vmem:[%s2364_s15] sm:$0x1] }
  0x41   : > { %1962 = vmatprep.mubr.msk.f32.mxu0 %vm2225_vm0, %v2224_v0  ;;  %1967 = vmatprep.mubr.msk.f32.mxu1 %vm2225_vm0, %v2224_v0  ;;  %v195_v3 = vld [vmem:[%s2364_s15 + $0x8] sm:$0x1]  ;;  %vm229_vm7 = vcmask 1047559   ;;  %v196_v4 = vld [vmem:[%s2364_s15 + $0x10] sm:$0x1]  ;;  %vm231_vm8 = vcmask 64512  }
  0x42   : > { %1961 = vmatpush3.msra.mxu0 %v2376_v1  ;;  %1966 = vmatpush3.msra.mxu1 %v2376_v1  ;;  %v197_v5 = vld [vmem:[%s2364_s15 + $0x18] sm:$0x1]  ;;  %v198_v6 = vld [vmem:[%s2364_s15 + $0x20] sm:$0x1]  ;;  %v199_v7 = vld [vmem:[%s2364_s15 + $0x28] sm:$0x1] }
  0x43   : > { %1970 = vmatprep.subr.mxu0 %v2224_v0  ;;  %1975 = vmatprep.subr.mxu1 %v2224_v0  ;;  %v200_v8 = vld [vmem:[%s2364_s15 + $0x30] sm:$0x1]  ;;  %v201_v9 = vld [vmem:[%s2364_s15 + $0x38] sm:$0x1]  ;;  %v210_v10 = vrot.slane %v195_v3, 7  ;;  %v213_v11 = vrot.slane %v196_v4, 6 }
  0x44   : > { %v216_v12 = vrot.slane %v197_v5, 5  ;;  %v219_v13 = vrot.slane %v198_v6, 4  ;;  %v222_v14 = vrot.slane %v199_v7, 3  ;;  %v225_v15 = vrot.slane %v200_v8, 2  ;;  %v403_v17 = vld [vmem:[%s2364_s15 + $0x1] sm:$0x1] }
  0x45   : > { %v228_v16 = vrot.slane %v201_v9, 1  ;;  %v404_v18 = vld [vmem:[%s2364_s15 + $0x9] sm:$0x1]  ;;  %v212_v19 = vsel %vm211_vm1, %v210_v10, %v194_v2  ;;  %v405_v20 = vld [vmem:[%s2364_s15 + $0x11] sm:$0x1]  ;;  %s1928_s18 = sshll.u32 %s2360_s29, 7 }
  0x46   : > { %v406_v21 = vld [vmem:[%s2364_s15 + $0x19] sm:$0x1]  ;;  %v407_v22 = vld [vmem:[%s2364_s15 + $0x21] sm:$0x1]  ;;  %v215_v23 = vsel %vm214_vm2, %v213_v11, %v212_v19  ;;  %v408_v24 = vld [vmem:[%s2364_s15 + $0x29] sm:$0x1] }
  0x47   : > { %v409_v25 = vld [vmem:[%s2364_s15 + $0x31] sm:$0x1]  ;;  %v410_v26 = vld [vmem:[%s2364_s15 + $0x39] sm:$0x1]  ;;  %v218_v27 = vsel %vm217_vm3, %v216_v12, %v215_v23  ;;  %v419_v28 = vrot.slane %v404_v18, 7  ;;  %v421_v29 = vrot.slane %v405_v20, 6 }
  0x48   : > { %v423_v30 = vrot.slane %v406_v21, 5  ;;  %v603_v31 = vld [vmem:[%s2364_s15 + $0x2] sm:$0x1]  ;;  %v221_v32 = vsel %vm220_vm4, %v219_v13, %v218_v27  ;;  %v425_v33 = vrot.slane %v407_v22, 4  ;;  %v427_v34 = vrot.slane %v408_v24, 3  ;;  %s2548_s20 = scalar_lea.vmem [#allocation7], %s1928_s18 }
  0x49   : > { %v429_v35 = vrot.slane %v409_v25, 2  ;;  %v604_v36 = vld [vmem:[%s2364_s15 + $0xa] sm:$0x1]  ;;  %v224_v37 = vsel %vm223_vm5, %v222_v14, %v221_v32  ;;  %v420_v38 = vsel %vm211_vm1, %v419_v28, %v403_v17  ;;  %v431_v39 = vrot.slane %v410_v26, 1  ;;  %v605_v40 = vld [vmem:[%s2364_s15 + $0x12] sm:$0x1] }
  0x4a   : > { %v606_v41 = vld [vmem:[%s2364_s15 + $0x1a] sm:$0x1]  ;;  %v619_v42 = vrot.slane %v604_v36, 7  ;;  %v227_v43 = vsel %vm226_vm6, %v225_v15, %v224_v37  ;;  %v422_v44 = vsel %vm214_vm2, %v421_v29, %v420_v38  ;;  %v607_v45 = vld [vmem:[%s2364_s15 + $0x22] sm:$0x1]  ;;  %v621_v52 = vrot.slane %v605_v40, 6 }
  0x4b   : > { %v608_v46 = vld [vmem:[%s2364_s15 + $0x2a] sm:$0x1]  ;;  %v609_v47 = vld [vmem:[%s2364_s15 + $0x32] sm:$0x1]  ;;  %v230_v48 = vsel %vm229_vm7, %v228_v16, %v227_v43  ;;  %v424_v49 = vsel %vm217_vm3, %v423_v30, %v422_v44  ;;  %v610_v50 = vld [vmem:[%s2364_s15 + $0x3a] sm:$0x1] }
  0x4c   : > { %v620_v51 = vsel %vm211_vm1, %v619_v42, %v603_v31  ;;  %1963 = vmatmul.mubr.msk.f32.vlgmr.msra.gmra.mxu0 %vm231_vm8, %v230_v48  ;;  %v426_v53 = vsel %vm220_vm4, %v425_v33, %v424_v49  ;;  %v623_v54 = vrot.slane %v606_v41, 5  ;;  %v625_v55 = vrot.slane %v607_v45, 4  ;;  %v803_v57 = vld [vmem:[%s2364_s15 + $0x3] sm:$0x1]  ;;  %v804_v58 = vld [vmem:[%s2364_s15 + $0xb] sm:$0x1] }
  0x4d   : > { %v627_v56 = vrot.slane %v608_v46, 3  ;;  %v428_v59 = vsel %vm223_vm5, %v427_v34, %v426_v53  ;;  %1971 = vmatpush3.msra.mxu0 %v2376_v1  ;;  %1972 = vmatprep.mubr.msk.f32.mxu0 %vm2225_vm0, %v2224_v0  ;;  %v622_v60 = vsel %vm214_vm2, %v621_v52, %v620_v51  ;;  %v629_v61 = vrot.slane %v609_v47, 2  ;;  %v805_v63 = vld [vmem:[%s2364_s15 + $0x13] sm:$0x1]  ;;  %v806_v2 = vld [vmem:[%s2364_s15 + $0x1b] sm:$0x1] }
  0x4e   : > { %v631_v62 = vrot.slane %v610_v50, 1  ;;  %v430_v3 = vsel %vm226_vm6, %v429_v35, %v428_v59  ;;  %1980 = vmatprep.subr.mxu0 %v2224_v0  ;;  %v624_v4 = vsel %vm217_vm3, %v623_v54, %v622_v60  ;;  %v807_v5 = vld [vmem:[%s2364_s15 + $0x23] sm:$0x1]  ;;  %v808_v6 = vld [vmem:[%s2364_s15 + $0x2b] sm:$0x1]  ;;  %v819_v11 = vrot.slane %v804_v58, 7 }
  0x4f   : > { %v809_v7 = vld [vmem:[%s2364_s15 + $0x33] sm:$0x1]  ;;  %v432_v8 = vsel %vm229_vm7, %v431_v39, %v430_v3  ;;  %v626_v9 = vsel %vm220_vm4, %v625_v55, %v624_v4  ;;  %v810_v10 = vld [vmem:[%s2364_s15 + $0x3b] sm:$0x1]  ;;  %v821_v12 = vrot.slane %v805_v63, 6  ;;  %v823_v14 = vrot.slane %v806_v2, 5 }
  0x50   : > { %1968 = vmatmul.mubr.msk.f32.vlgmr.msra.gmra.mxu1 %vm231_vm8, %v432_v8  ;;  %v628_v13 = vsel %vm223_vm5, %v627_v56, %v626_v9  ;;  %v825_v15 = vrot.slane %v807_v5, 4  ;;  %v827_v16 = vrot.slane %v808_v6, 3  ;;  %v1003_v17 = vld [vmem:[%s2364_s15 + $0x4] sm:$0x1]  ;;  %v1004_v18 = vld [vmem:[%s2364_s15 + $0xc] sm:$0x1]  ;;  %v820_v20 = vsel %vm211_vm1, %v819_v11, %v803_v57 }
  0x51   : > { %1976 = vmatpush3.msra.mxu1 %v2376_v1  ;;  %1977 = vmatprep.mubr.msk.f32.mxu1 %vm2225_vm0, %v2224_v0  ;;  %v630_v19 = vsel %vm226_vm6, %v629_v61, %v628_v13  ;;  %v829_v21 = vrot.slane %v809_v7, 2  ;;  %v831_v22 = vrot.slane %v810_v10, 1  ;;  %v1005_v23 = vld [vmem:[%s2364_s15 + $0x14] sm:$0x1]  ;;  %v1006_v24 = vld [vmem:[%s2364_s15 + $0x1c] sm:$0x1]  ;;  %v822_v26 = vsel %vm214_vm2, %v821_v12, %v820_v20 }
  0x52   : > { %1985 = vmatprep.subr.mxu1 %v2224_v0  ;;  %v632_v25 = vsel %vm229_vm7, %v631_v62, %v630_v19  ;;  %v1007_v27 = vld [vmem:[%s2364_s15 + $0x24] sm:$0x1]  ;;  %v1008_v28 = vld [vmem:[%s2364_s15 + $0x2c] sm:$0x1]  ;;  %v1009_v29 = vld [vmem:[%s2364_s15 + $0x34] sm:$0x1]  ;;  %v824_v30 = vsel %vm217_vm3, %v823_v14, %v822_v26 }
  0x53   : > { %1973 = vmatmul.mubr.msk.f32.vlgmr.msra.gmra.mxu0 %vm231_vm8, %v632_v25  ;;  %v1010_v31 = vld [vmem:[%s2364_s15 + $0x3c] sm:$0x1]  ;;  %v1019_v32 = vrot.slane %v1004_v18, 7  ;;  %v1021_v33 = vrot.slane %v1005_v23, 6  ;;  %v1023_v34 = vrot.slane %v1006_v24, 5  ;;  %v826_v35 = vsel %vm220_vm4, %v825_v15, %v824_v30  ;;  %s1943_s23 = sshll.u32 %s2210_s12, 11 }
  0x54   : > { %1981 = vmatpush3.msra.mxu0 %v2376_v1  ;;  %1982 = vmatprep.mubr.msk.f32.mxu0 %vm2225_vm0, %v2224_v0  ;;  %v1025_v36 = vrot.slane %v1007_v27, 4  ;;  %v1027_v37 = vrot.slane %v1008_v28, 3  ;;  %v1203_v38 = vld [vmem:[%s2364_s15 + $0x5] sm:$0x1]  ;;  %v828_v39 = vsel %vm223_vm5, %v827_v16, %v826_v35  ;;  %v1029_v41 = vrot.slane %v1009_v29, 2  ;;  %s1819_s26 = sshll.u32 %s2548_s20, 4  ;;  %s2771_s19 = scalar_lea.hbm %s2841_s2, %s1943_s23  ;;  %s2773_s26 = int_to_ptr.vmem [resolvable:$true] %s1819_s26 }
  0x55   : > { %1990 = vmatprep.subr.mxu0 %v2224_v0  ;;  %v1020_v40 = vsel %vm211_vm1, %v1019_v32, %v1003_v17  ;;  %v1031_v42 = vrot.slane %v1010_v31, 1  ;;  %v1204_v43 = vld [vmem:[%s2364_s15 + $0xd] sm:$0x1]  ;;  %v1205_v44 = vld [vmem:[%s2364_s15 + $0x15] sm:$0x1]  ;;  %v830_v45 = vsel %vm226_vm6, %v829_v21, %v828_v39  ;;  %vm394_vm9 = vcmask 123904  }
  0x56   : > { %v1022_v46 = vsel %vm214_vm2, %v1021_v33, %v1020_v40  ;;  %v1206_v47 = vld [vmem:[%s2364_s15 + $0x1d] sm:$0x1]  ;;  %v1207_v48 = vld [vmem:[%s2364_s15 + $0x25] sm:$0x1]  ;;  %v1208_v49 = vld [vmem:[%s2364_s15 + $0x2d] sm:$0x1]  ;;  %v832_v50 = vsel %vm229_vm7, %v831_v22, %v830_v45 }
  0x57   : > { %v1024_v51 = vsel %vm217_vm3, %v1023_v34, %v1022_v46  ;;  %v1209_v52 = vld [vmem:[%s2364_s15 + $0x35] sm:$0x1]  ;;  %v1210_v53 = vld [vmem:[%s2364_s15 + $0x3d] sm:$0x1]  ;;  %v1219_v54 = vrot.slane %v1204_v43, 7  ;;  %v1221_v55 = vrot.slane %v1205_v44, 6  ;;  %1978 = vmatmul.mubr.msk.f32.vlgmr.msra.gmra.mxu1 %vm231_vm8, %v832_v50 }
  0x58   : > { %v1026_v56 = vsel %vm220_vm4, %v1025_v36, %v1024_v51  ;;  %v1223_v57 = vrot.slane %v1206_v47, 5  ;;  %v1225_v58 = vrot.slane %v1207_v48, 4  ;;  %v1227_v59 = vrot.slane %v1208_v49, 3  ;;  %v1403_v60 = vld [vmem:[%s2364_s15 + $0x6] sm:$0x1]  ;;  %1986 = vmatpush3.msra.mxu1 %v2376_v1  ;;  %1987 = vmatprep.mubr.msk.f32.mxu1 %vm2225_vm0, %v2224_v0  ;;  %s1804_s24 = scalar_lea.sflag [#allocation4], %s2360_s29 }
  0x59   : > { %v1028_v61 = vsel %vm223_vm5, %v1027_v37, %v1026_v56  ;;  %v1220_v62 = vsel %vm211_vm1, %v1219_v54, %v1203_v38  ;;  %v1229_v63 = vrot.slane %v1209_v52, 2  ;;  %v1231_v2 = vrot.slane %v1210_v53, 1  ;;  %v1404_v3 = vld [vmem:[%s2364_s15 + $0xe] sm:$0x1]  ;;  %v1405_v4 = vld [vmem:[%s2364_s15 + $0x16] sm:$0x1]  ;;  %1995 = vmatprep.subr.mxu1 %v2224_v0 }
  0x5a   : > { %v1030_v5 = vsel %vm226_vm6, %v1029_v41, %v1028_v61  ;;  %v1222_v6 = vsel %vm214_vm2, %v1221_v55, %v1220_v62  ;;  %v1406_v7 = vld [vmem:[%s2364_s15 + $0x1e] sm:$0x1]  ;;  %v1407_v8 = vld [vmem:[%s2364_s15 + $0x26] sm:$0x1]  ;;  %v1408_v9 = vld [vmem:[%s2364_s15 + $0x2e] sm:$0x1]  ;;  %v309_v54 = vlaneseq }
  0x5b   : > { %v1032_v10 = vsel %vm229_vm7, %v1031_v42, %v1030_v5  ;;  %v1224_v11 = vsel %vm217_vm3, %v1223_v57, %v1222_v6  ;;  %v1409_v12 = vld [vmem:[%s2364_s15 + $0x36] sm:$0x1]  ;;  %v1410_v13 = vld [vmem:[%s2364_s15 + $0x3e] sm:$0x1]  ;;  %v1419_v14 = vrot.slane %v1404_v3, 7  ;;  %v1421_v15 = vrot.slane %v1405_v4, 6 }
  0x5c   : > { %1983 = vmatmul.mubr.msk.f32.vlgmr.msra.gmra.mxu0 %vm231_vm8, %v1032_v10  ;;  %v1226_v16 = vsel %vm220_vm4, %v1225_v58, %v1224_v11  ;;  %v1423_v17 = vrot.slane %v1406_v7, 5  ;;  %v1425_v18 = vrot.slane %v1407_v8, 4  ;;  %v1427_v19 = vrot.slane %v1408_v9, 3  ;;  %v1603_v20 = vld [vmem:[%s2364_s15 + $0x7] sm:$0x1]  ;;  %s2134_s30 = scalar_lea.vmem %s2773_s26, 2048 }
  0x5d   : > { %v1228_v21 = vsel %vm223_vm5, %v1227_v59, %v1226_v16  ;;  %1991 = vmatpush3.msra.mxu0 %v2376_v1  ;;  %1992 = vmatprep.mubr.msk.f32.mxu0 %vm2225_vm0, %v2224_v0  ;;  %v1420_v22 = vsel %vm211_vm1, %v1419_v14, %v1403_v60  ;;  %v1429_v23 = vrot.slane %v1409_v12, 2  ;;  %v1431_v24 = vrot.slane %v1410_v13, 1  ;;  %v1604_v25 = vld [vmem:[%s2364_s15 + $0xf] sm:$0x1]  ;;  %v1605_v26 = vld [vmem:[%s2364_s15 + $0x17] sm:$0x1]  ;;  %p2135_p3 = scmp.ne.s32.totalorder %s2773_s26, %s2134_s30 }
  0x5e   : > { %v1230_v27 = vsel %vm226_vm6, %v1229_v63, %v1228_v21  ;;  %v1422_v28 = vsel %vm214_vm2, %v1421_v15, %v1420_v22  ;;  %v1606_v29 = vld [vmem:[%s2364_s15 + $0x1f] sm:$0x1]  ;;  %v1607_v30 = vld [vmem:[%s2364_s15 + $0x27] sm:$0x1]  ;;  %v1608_v31 = vld [vmem:[%s2364_s15 + $0x2f] sm:$0x1] }
  0x5f   : > { %v1232_v32 = vsel %vm229_vm7, %v1231_v2, %v1230_v27  ;;  %v1424_v33 = vsel %vm217_vm3, %v1423_v17, %v1422_v28  ;;  %v1609_v34 = vld [vmem:[%s2364_s15 + $0x37] sm:$0x1]  ;;  %v1619_v35 = vrot.slane %v1604_v25, 7  ;;  %v1621_v36 = vrot.slane %v1605_v26, 6  ;;  %v1610_v38 = vld [vmem:[%s2364_s15 + $0x3f] sm:$0x1] }
  0x60   : > { %1988 = vmatmul.mubr.msk.f32.vlgmr.msra.gmra.mxu1 %vm231_vm8, %v1232_v32  ;;  %v1426_v37 = vsel %vm220_vm4, %v1425_v18, %v1424_v33  ;;  %v1623_v39 = vrot.slane %v1606_v29, 5  ;;  %v1625_v40 = vrot.slane %v1607_v30, 4  ;;  %v1627_v43 = vrot.slane %v1608_v31, 3  ;;  %p2853_p13 = scmp.ne.s32.totalorder %s2847_s21, 0  ;;  %s2227_s25 = smov [#allocation7]  }
  0x61   : > { %1996 = vmatpush3.msra.mxu1 %v2376_v1  ;;  %1997 = vmatprep.mubr.msk.f32.mxu1 %vm2225_vm0, %v2224_v0  ;;  %v1428_v41 = vsel %vm223_vm5, %v1427_v19, %v1426_v37  ;;  %v1620_v42 = vsel %vm211_vm1, %v1619_v35, %v1603_v20  ;;  %v1629_v46 = vrot.slane %v1609_v34, 2  ;;  %v1631_v49 = vrot.slane %v1610_v38, 1  ;;  %s2138_s3 = sshll.u32 %s2227_s25, 4  ;;  %s2139_s3 = int_to_ptr.vmem [resolvable:$false] %s2138_s3 }
  0x62   : > { %v1430_v44 = vsel %vm226_vm6, %v1429_v23, %v1428_v41  ;;  %v1622_v45 = vsel %vm214_vm2, %v1621_v36, %v1620_v42  ;;  %v2226_v52 = vmov 1966171168   ;;  %v310_v56 = vshrl.u32 %v309_v54, 7  ;;  %p2136_p5 = pnand %p2135_p3, %p2853_p13  ;;  %s2140_s4 = scalar_lea.vmem %s2139_s3, 4096 }
  0x63   : > { %v1432_v47 = vsel %vm229_vm7, %v1431_v24, %v1430_v44  ;;  %v1624_v48 = vsel %vm217_vm3, %v1623_v39, %v1622_v45  ;;  %v307_v53 = vunpack.c.l.s4 %v2226_v52  ;;  %p2141_p12 = scmp.lt.s32.totalorder %s2773_s26, %s2139_s3  ;;  %p2142_p7 = scmp.lt.s32.totalorder %s2140_s4, %s2134_s30 }
  0x64   : > { %1993 = vmatmul.mubr.msk.f32.vlgmr.msra.gmra.mxu0 %vm231_vm8, %v1432_v47  ;;  %v1626_v0 = vsel %vm220_vm4, %v1625_v40, %v1624_v48  ;;  %v2536_v61 = vsub.s32 0, %v310_v56  ;;  %p2137_p1 = pneg %p2136_p5 }
  0x65   : > { %v1628_v1 = vsel %vm223_vm5, %v1627_v43, %v1626_v0  ;;  %v308_v55 = vunpack.c.0.s8 %v307_v53  ;;  %p2143_p8 = por %p2142_p7, %p2141_p12 }
  0x66   : > { %v1630_v50 = vsel %vm226_vm6, %v1629_v46, %v1628_v1 }
  0x67   : > { %v1632_v51 = vsel %vm229_vm7, %v1631_v49, %v1630_v50  ;;  %v2532_v57 = vsub.s32 %v308_v55, %v310_v56  ;;  %p2144_p9 = pnand %p2143_p8, %p2137_p1 }
  0x68   : > { %1998 = vmatmul.mubr.msk.f32.vlgmr.msra.gmra.mxu1 %vm231_vm8, %v1632_v51 }
 0x10c   : > { %v300_v58 = vpop.f32.mrf.mxu0 }
 0x10d   : > { %v305_v59 = vcombine.high %v300_v58, %v300_v58  ;;  %v312_v60 = vrot.slane %v300_v58, %v2532_v57 }
 0x10e   : > { %v1964_v62 = vpop.f32.mrf.mxu0 }
 0x10f   : > { %v319_v63 = vrot.slane %v305_v59, %v2532_v57  ;;  %v320_v2 = vcombine.high %v312_v60, %v312_v60  ;;  %v328_v3 = vrot.slane %v312_v60, %v2532_v57 }
 0x110   : > { %v501_v4 = vpop.f32.mrf.mxu1 }
 0x111   : > { %v321_v5 = vcombine.high %v319_v63, %v319_v63  ;;  %v335_v6 = vrot.slane %v319_v63, %v2532_v57  ;;  %v342_v7 = vrot.slane %v320_v2, %v2532_v57  ;;  %v350_v8 = vcombine.high %v328_v3, %v328_v3 }
 0x112   : > { %v357_v9 = vrot.slane %v328_v3, %v2536_v61  ;;  %v506_v10 = vcombine.high %v501_v4, %v501_v4  ;;  %v513_v11 = vrot.slane %v501_v4, %v2532_v57  ;;  %v1969_v12 = vpop.f32.mrf.mxu1 }
 0x113   : > { %v349_v13 = vrot.slane %v321_v5, %v2532_v57  ;;  %v351_v14 = vcombine.high %v335_v6, %v335_v6  ;;  %v352_v15 = vcombine.high %v342_v7, %v342_v7  ;;  %v361_v16 = vrot.slane %v342_v7, %v2536_v61  ;;  %v701_v17 = vpop.f32.mrf.mxu0 }
 0x114   : > { %v365_v18 = vrot.slane %v350_v8, %v2536_v61  ;;  %v373_v19 = vrot.slane %v335_v6, %v2536_v61  ;;  %395 = vst.msk [vmem:[%s2548_s20] sm:$0x3] %vm394_vm9, %v357_v9  ;;  %v520_v20 = vrot.slane %v506_v10, %v2532_v57  ;;  %v521_v21 = vcombine.high %v513_v11, %v513_v11 }
 0x115   : > { %v353_v22 = vcombine.high %v349_v13, %v349_v13  ;;  %v369_v23 = vrot.slane %v352_v15, %v2536_v61  ;;  %v377_v24 = vrot.slane %v349_v13, %v2536_v61  ;;  %v381_v25 = vrot.slane %v351_v14, %v2536_v61  ;;  %396 = vst.msk [vmem:[%s2548_s20 + $0x10] sm:$0x3] %vm394_vm9, %v361_v16  ;;  %v1974_v26 = vpop.f32.mrf.mxu0 }
 0x116   : > { %397 = vst.msk [vmem:[%s2548_s20 + $0x20] sm:$0x3] %vm394_vm9, %v365_v18  ;;  %399 = vst.msk [vmem:[%s2548_s20 + $0x40] sm:$0x3] %vm394_vm9, %v373_v19  ;;  %v522_v27 = vcombine.high %v520_v20, %v520_v20  ;;  %v529_v28 = vrot.slane %v513_v11, %v2532_v57  ;;  %v536_v29 = vrot.slane %v520_v20, %v2532_v57 }
 0x117   : > { %v543_v30 = vrot.slane %v521_v21, %v2532_v57  ;;  %v385_v31 = vrot.slane %v353_v22, %v2536_v61  ;;  %398 = vst.msk [vmem:[%s2548_s20 + $0x30] sm:$0x3] %vm394_vm9, %v369_v23  ;;  %400 = vst.msk [vmem:[%s2548_s20 + $0x50] sm:$0x3] %vm394_vm9, %v377_v24  ;;  %v706_v32 = vcombine.high %v701_v17, %v701_v17  ;;  %v901_v38 = vpop.f32.mrf.mxu1 }
 0x118   : > { %401 = vst.msk [vmem:[%s2548_s20 + $0x60] sm:$0x3] %vm394_vm9, %v381_v25  ;;  %v713_v33 = vrot.slane %v701_v17, %v2532_v57  ;;  %v550_v34 = vrot.slane %v522_v27, %v2532_v57  ;;  %v551_v35 = vcombine.high %v529_v28, %v529_v28  ;;  %v552_v36 = vcombine.high %v536_v29, %v536_v29 }
 0x119   : > { %v553_v37 = vcombine.high %v543_v30, %v543_v30  ;;  %402 = vst.msk [vmem:[%s2548_s20 + $0x70] sm:$0x3] %vm394_vm9, %v385_v31  ;;  %v558_v39 = vrot.slane %v529_v28, %v2536_v61  ;;  %v562_v40 = vrot.slane %v543_v30, %v2536_v61  ;;  %v574_v41 = vrot.slane %v536_v29, %v2536_v61  ;;  %v1979_v47 = vpop.f32.mrf.mxu1 }
 0x11a   : > { %v720_v42 = vrot.slane %v706_v32, %v2532_v57  ;;  %v554_v43 = vcombine.high %v550_v34, %v550_v34  ;;  %v566_v44 = vrot.slane %v551_v35, %v2536_v61  ;;  %v578_v46 = vrot.slane %v550_v34, %v2536_v61 }
 0x11b   : > { %v570_v45 = vrot.slane %v553_v37, %v2536_v61  ;;  %v582_v48 = vrot.slane %v552_v36, %v2536_v61  ;;  %595 = vst.msk [vmem:[%s2548_s20 + $0x2] sm:$0x3] %vm394_vm9, %v558_v39  ;;  %596 = vst.msk [vmem:[%s2548_s20 + $0x12] sm:$0x3] %vm394_vm9, %v562_v40  ;;  %v721_v49 = vcombine.high %v713_v33, %v713_v33 }
 0x11c   : > { %599 = vst.msk [vmem:[%s2548_s20 + $0x42] sm:$0x3] %vm394_vm9, %v574_v41  ;;  %v722_v0 = vcombine.high %v720_v42, %v720_v42  ;;  %v729_v1 = vrot.slane %v713_v33, %v2532_v57  ;;  %v586_v50 = vrot.slane %v554_v43, %v2536_v61  ;;  %597 = vst.msk [vmem:[%s2548_s20 + $0x22] sm:$0x3] %vm394_vm9, %v566_v44  ;;  %v1101_v54 = vpop.f32.mrf.mxu0 }
 0x11d   : > { %598 = vst.msk [vmem:[%s2548_s20 + $0x32] sm:$0x3] %vm394_vm9, %v570_v45  ;;  %600 = vst.msk [vmem:[%s2548_s20 + $0x52] sm:$0x3] %vm394_vm9, %v578_v46  ;;  %v736_v51 = vrot.slane %v720_v42, %v2532_v57  ;;  %v906_v52 = vcombine.high %v901_v38, %v901_v38  ;;  %v913_v53 = vrot.slane %v901_v38, %v2532_v57 }
 0x11e   : > { %601 = vst.msk [vmem:[%s2548_s20 + $0x62] sm:$0x3] %vm394_vm9, %v582_v48  ;;  %v743_v55 = vrot.slane %v721_v49, %v2532_v57  ;;  %v750_v56 = vrot.slane %v722_v0, %v2532_v57  ;;  %v751_v58 = vcombine.high %v729_v1, %v729_v1  ;;  %v758_v59 = vrot.slane %v729_v1, %v2536_v61  ;;  %v1984_v3 = vpop.f32.mrf.mxu0 }
 0x11f   : > { %602 = vst.msk [vmem:[%s2548_s20 + $0x72] sm:$0x3] %vm394_vm9, %v586_v50  ;;  %v752_v60 = vcombine.high %v736_v51, %v736_v51  ;;  %v774_v62 = vrot.slane %v736_v51, %v2536_v61  ;;  %v920_v63 = vrot.slane %v906_v52, %v2532_v57  ;;  %v921_v2 = vcombine.high %v913_v53, %v913_v53 }
 0x120   : > { %v753_v4 = vcombine.high %v743_v55, %v743_v55  ;;  %v754_v5 = vcombine.high %v750_v56, %v750_v56  ;;  %v762_v6 = vrot.slane %v743_v55, %v2536_v61  ;;  %v766_v7 = vrot.slane %v751_v58, %v2536_v61  ;;  %795 = vst.msk [vmem:[%s2548_s20 + $0x4] sm:$0x3] %vm394_vm9, %v758_v59  ;;  %v1301_v12 = vpop.f32.mrf.mxu1 }
 0x121   : > { %v778_v8 = vrot.slane %v750_v56, %v2536_v61  ;;  %v782_v9 = vrot.slane %v752_v60, %v2536_v61  ;;  %799 = vst.msk [vmem:[%s2548_s20 + $0x44] sm:$0x3] %vm394_vm9, %v774_v62  ;;  %v922_v10 = vcombine.high %v920_v63, %v920_v63  ;;  %v929_v11 = vrot.slane %v913_v53, %v2532_v57 }
 0x122   : > { %v770_v13 = vrot.slane %v753_v4, %v2536_v61  ;;  %v786_v14 = vrot.slane %v754_v5, %v2536_v61  ;;  %796 = vst.msk [vmem:[%s2548_s20 + $0x14] sm:$0x3] %vm394_vm9, %v762_v6  ;;  %797 = vst.msk [vmem:[%s2548_s20 + $0x24] sm:$0x3] %vm394_vm9, %v766_v7  ;;  %v936_v15 = vrot.slane %v920_v63, %v2532_v57  ;;  %v1989_v21 = vpop.f32.mrf.mxu1 }
 0x123   : > { %v943_v16 = vrot.slane %v921_v2, %v2532_v57  ;;  %800 = vst.msk [vmem:[%s2548_s20 + $0x54] sm:$0x3] %vm394_vm9, %v778_v8  ;;  %801 = vst.msk [vmem:[%s2548_s20 + $0x64] sm:$0x3] %vm394_vm9, %v782_v9  ;;  %v950_v17 = vrot.slane %v922_v10, %v2532_v57  ;;  %v951_v18 = vcombine.high %v929_v11, %v929_v11 }
 0x124   : > { %v958_v19 = vrot.slane %v929_v11, %v2536_v61  ;;  %v1106_v20 = vcombine.high %v1101_v54, %v1101_v54  ;;  %798 = vst.msk [vmem:[%s2548_s20 + $0x34] sm:$0x3] %vm394_vm9, %v770_v13  ;;  %802 = vst.msk [vmem:[%s2548_s20 + $0x74] sm:$0x3] %vm394_vm9, %v786_v14  ;;  %v952_v22 = vcombine.high %v936_v15, %v936_v15  ;;  %v2643_v30 = vpop.f32.mrf.mxu0 }
 0x125   : > { %v953_v23 = vcombine.high %v943_v16, %v943_v16  ;;  %v962_v24 = vrot.slane %v943_v16, %v2536_v61  ;;  %v974_v25 = vrot.slane %v936_v15, %v2536_v61  ;;  %v954_v26 = vcombine.high %v950_v17, %v950_v17 }
 0x126   : > { %v966_v27 = vrot.slane %v951_v18, %v2536_v61  ;;  %v978_v28 = vrot.slane %v950_v17, %v2536_v61  ;;  %995 = vst.msk [vmem:[%s2548_s20 + $0x6] sm:$0x3] %vm394_vm9, %v958_v19  ;;  %v1113_v29 = vrot.slane %v1101_v54, %v2532_v57  ;;  %v982_v32 = vrot.slane %v952_v22, %v2536_v61  ;;  %v1994_v39 = vpop.f32.mrf.mxu0 }
 0x127   : > { %v970_v31 = vrot.slane %v953_v23, %v2536_v61  ;;  %996 = vst.msk [vmem:[%s2548_s20 + $0x16] sm:$0x3] %vm394_vm9, %v962_v24  ;;  %999 = vst.msk [vmem:[%s2548_s20 + $0x46] sm:$0x3] %vm394_vm9, %v974_v25  ;;  %v1120_v33 = vrot.slane %v1106_v20, %v2532_v57  ;;  %v1306_v34 = vcombine.high %v1301_v12, %v1301_v12 }
 0x128   : > { %v986_v35 = vrot.slane %v954_v26, %v2536_v61  ;;  %997 = vst.msk [vmem:[%s2548_s20 + $0x26] sm:$0x3] %vm394_vm9, %v966_v27  ;;  %1000 = vst.msk [vmem:[%s2548_s20 + $0x56] sm:$0x3] %vm394_vm9, %v978_v28  ;;  %v1121_v36 = vcombine.high %v1113_v29, %v1113_v29  ;;  %v1129_v37 = vrot.slane %v1113_v29, %v2532_v57  ;;  %v1701_v48 = vpop.f32.mrf.mxu1 }
 0x129   : > { %v1313_v38 = vrot.slane %v1301_v12, %v2532_v57  ;;  %998 = vst.msk [vmem:[%s2548_s20 + $0x36] sm:$0x3] %vm394_vm9, %v970_v31  ;;  %1001 = vst.msk [vmem:[%s2548_s20 + $0x66] sm:$0x3] %vm394_vm9, %v982_v32  ;;  %v1122_v40 = vcombine.high %v1120_v33, %v1120_v33  ;;  %v1136_v41 = vrot.slane %v1120_v33, %v2532_v57 }
 0x12a   : > { %v1320_v42 = vrot.slane %v1306_v34, %v2532_v57  ;;  %v1506_v43 = vcombine.high %v2643_v30, %v2643_v30  ;;  %1002 = vst.msk [vmem:[%s2548_s20 + $0x76] sm:$0x3] %vm394_vm9, %v986_v35  ;;  %v1143_v44 = vrot.slane %v1121_v36, %v2532_v57  ;;  %v1151_v45 = vcombine.high %v1129_v37, %v1129_v37  ;;  %v1999_v55 = vpop.f32.mrf.mxu1 }
 0x12b   : > { %v1158_v46 = vrot.slane %v1129_v37, %v2536_v61  ;;  %v1321_v47 = vcombine.high %v1313_v38, %v1313_v38  ;;  %v1150_v49 = vrot.slane %v1122_v40, %v2532_v57  ;;  %v1152_v0 = vcombine.high %v1136_v41, %v1136_v41 }
 0x12c   : > { %v1174_v1 = vrot.slane %v1136_v41, %v2536_v61  ;;  %v1322_v50 = vcombine.high %v1320_v42, %v1320_v42  ;;  %v1153_v51 = vcombine.high %v1143_v44, %v1143_v44  ;;  %v1162_v52 = vrot.slane %v1143_v44, %v2536_v61 }
 0x12d   : > { %v1166_v53 = vrot.slane %v1151_v45, %v2536_v61  ;;  %1195 = vst.msk [vmem:[%s2548_s20 + $0x8] sm:$0x3] %vm394_vm9, %v1158_v46  ;;  %v1329_v54 = vrot.slane %v1313_v38, %v2532_v57  ;;  %v1154_v56 = vcombine.high %v1150_v49, %v1150_v49  ;;  %v1178_v58 = vrot.slane %v1150_v49, %v2536_v61 }
 0x12e   : > { %v1182_v59 = vrot.slane %v1152_v0, %v2536_v61  ;;  %1199 = vst.msk [vmem:[%s2548_s20 + $0x48] sm:$0x3] %vm394_vm9, %v1174_v1  ;;  %v1336_v60 = vrot.slane %v1320_v42, %v2532_v57  ;;  %v1170_v62 = vrot.slane %v1153_v51, %v2536_v61  ;;  %1196 = vst.msk [vmem:[%s2548_s20 + $0x18] sm:$0x3] %vm394_vm9, %v1162_v52 }
 0x12f   : > { %1197 = vst.msk [vmem:[%s2548_s20 + $0x28] sm:$0x3] %vm394_vm9, %v1166_v53  ;;  %v1343_v63 = vrot.slane %v1321_v47, %v2532_v57  ;;  %v1350_v2 = vrot.slane %v1322_v50, %v2532_v57  ;;  %v1351_v3 = vcombine.high %v1329_v54, %v1329_v54  ;;  %v1186_v4 = vrot.slane %v1154_v56, %v2536_v61 }
 0x130   : > { %1200 = vst.msk [vmem:[%s2548_s20 + $0x58] sm:$0x3] %vm394_vm9, %v1178_v58  ;;  %1201 = vst.msk [vmem:[%s2548_s20 + $0x68] sm:$0x3] %vm394_vm9, %v1182_v59  ;;  %v1352_v5 = vcombine.high %v1336_v60, %v1336_v60  ;;  %v1358_v6 = vrot.slane %v1329_v54, %v2536_v61  ;;  %v1374_v7 = vrot.slane %v1336_v60, %v2536_v61 }
 0x131   : > { %1198 = vst.msk [vmem:[%s2548_s20 + $0x38] sm:$0x3] %vm394_vm9, %v1170_v62  ;;  %v1353_v8 = vcombine.high %v1343_v63, %v1343_v63  ;;  %v1354_v9 = vcombine.high %v1350_v2, %v1350_v2  ;;  %v1362_v10 = vrot.slane %v1343_v63, %v2536_v61  ;;  %v1366_v11 = vrot.slane %v1351_v3, %v2536_v61 }
 0x132   : > { %1202 = vst.msk [vmem:[%s2548_s20 + $0x78] sm:$0x3] %vm394_vm9, %v1186_v4  ;;  %v1378_v12 = vrot.slane %v1350_v2, %v2536_v61  ;;  %v1382_v13 = vrot.slane %v1352_v5, %v2536_v61  ;;  %1395 = vst.msk [vmem:[%s2548_s20 + $0xa] sm:$0x3] %vm394_vm9, %v1358_v6  ;;  %v1513_v14 = vrot.slane %v2643_v30, %v2532_v57 }
 0x133   : > { %1399 = vst.msk [vmem:[%s2548_s20 + $0x4a] sm:$0x3] %vm394_vm9, %v1374_v7  ;;  %v1520_v15 = vrot.slane %v1506_v43, %v2532_v57  ;;  %v1370_v16 = vrot.slane %v1353_v8, %v2536_v61  ;;  %v1386_v17 = vrot.slane %v1354_v9, %v2536_v61  ;;  %1396 = vst.msk [vmem:[%s2548_s20 + $0x1a] sm:$0x3] %vm394_vm9, %v1362_v10 }
 0x134   : > { %1397 = vst.msk [vmem:[%s2548_s20 + $0x2a] sm:$0x3] %vm394_vm9, %v1366_v11  ;;  %v1706_v18 = vcombine.high %v1701_v48, %v1701_v48  ;;  %v1713_v19 = vrot.slane %v1701_v48, %v2532_v57  ;;  %1400 = vst.msk [vmem:[%s2548_s20 + $0x5a] sm:$0x3] %vm394_vm9, %v1378_v12  ;;  %v1521_v20 = vcombine.high %v1513_v14, %v1513_v14 }
 0x135   : > { %1401 = vst.msk [vmem:[%s2548_s20 + $0x6a] sm:$0x3] %vm394_vm9, %v1382_v13  ;;  %v1522_v21 = vcombine.high %v1520_v15, %v1520_v15  ;;  %v1529_v22 = vrot.slane %v1513_v14, %v2532_v57  ;;  %v1536_v23 = vrot.slane %v1520_v15, %v2532_v57  ;;  %1398 = vst.msk [vmem:[%s2548_s20 + $0x3a] sm:$0x3] %vm394_vm9, %v1370_v16 }
 0x136   : > { %1402 = vst.msk [vmem:[%s2548_s20 + $0x7a] sm:$0x3] %vm394_vm9, %v1386_v17  ;;  %v1720_v24 = vrot.slane %v1706_v18, %v2532_v57  ;;  %v1721_v25 = vcombine.high %v1713_v19, %v1713_v19  ;;  %v1729_v26 = vrot.slane %v1713_v19, %v2532_v57  ;;  %v1543_v27 = vrot.slane %v1521_v20, %v2532_v57 }
 0x137   : > { %v1550_v28 = vrot.slane %v1522_v21, %v2532_v57  ;;  %v1551_v29 = vcombine.high %v1529_v22, %v1529_v22  ;;  %v1552_v30 = vcombine.high %v1536_v23, %v1536_v23  ;;  %v1558_v31 = vrot.slane %v1529_v22, %v2536_v61 }
 0x138   : > { %v1574_v32 = vrot.slane %v1536_v23, %v2536_v61  ;;  %v1722_v33 = vcombine.high %v1720_v24, %v1720_v24  ;;  %v1736_v34 = vrot.slane %v1720_v24, %v2532_v57  ;;  %v1553_v35 = vcombine.high %v1543_v27, %v1543_v27 }
 0x139   : > { %v1554_v36 = vcombine.high %v1550_v28, %v1550_v28  ;;  %v1562_v37 = vrot.slane %v1543_v27, %v2536_v61  ;;  %v1566_v38 = vrot.slane %v1551_v29, %v2536_v61  ;;  %v1578_v39 = vrot.slane %v1550_v28, %v2536_v61  ;;  %1595 = vst.msk [vmem:[%s2548_s20 + $0xc] sm:$0x3] %vm394_vm9, %v1558_v31 }
 0x13a   : > { %v1582_v40 = vrot.slane %v1552_v30, %v2536_v61  ;;  %1599 = vst.msk [vmem:[%s2548_s20 + $0x4c] sm:$0x3] %vm394_vm9, %v1574_v32  ;;  %v1743_v41 = vrot.slane %v1721_v25, %v2532_v57  ;;  %v1750_v42 = vrot.slane %v1722_v33, %v2532_v57  ;;  %v1570_v43 = vrot.slane %v1553_v35, %v2536_v61 }
 0x13b   : > { %v1586_v44 = vrot.slane %v1554_v36, %v2536_v61  ;;  %1596 = vst.msk [vmem:[%s2548_s20 + $0x1c] sm:$0x3] %vm394_vm9, %v1562_v37  ;;  %1597 = vst.msk [vmem:[%s2548_s20 + $0x2c] sm:$0x3] %vm394_vm9, %v1566_v38  ;;  %v1751_v45 = vcombine.high %v1729_v26, %v1729_v26  ;;  %v1752_v46 = vcombine.high %v1736_v34, %v1736_v34 }
 0x13c   : > { %1600 = vst.msk [vmem:[%s2548_s20 + $0x5c] sm:$0x3] %vm394_vm9, %v1578_v39  ;;  %1601 = vst.msk [vmem:[%s2548_s20 + $0x6c] sm:$0x3] %vm394_vm9, %v1582_v40  ;;  %v1753_v57 = vcombine.high %v1743_v41, %v1743_v41  ;;  %v1754_v47 = vcombine.high %v1750_v42, %v1750_v42  ;;  %v1758_v48 = vrot.slane %v1729_v26, %v2536_v61 }
 0x13d   : > { %v1762_v49 = vrot.slane %v1743_v41, %v2536_v61  ;;  %1598 = vst.msk [vmem:[%s2548_s20 + $0x3c] sm:$0x3] %vm394_vm9, %v1570_v43  ;;  %1602 = vst.msk [vmem:[%s2548_s20 + $0x7c] sm:$0x3] %vm394_vm9, %v1586_v44  ;;  %v1766_v0 = vrot.slane %v1751_v45, %v2536_v61  ;;  %v1774_v1 = vrot.slane %v1736_v34, %v2536_v61 }
 0x13e   : > { %v1778_v50 = vrot.slane %v1750_v42, %v2536_v61  ;;  %v1782_v51 = vrot.slane %v1752_v46, %v2536_v61  ;;  %v1770_v52 = vrot.slane %v1753_v57, %v2536_v61  ;;  %v1786_v53 = vrot.slane %v1754_v47, %v2536_v61  ;;  %1795 = vst.msk [vmem:[%s2548_s20 + $0xe] sm:$0x3] %vm394_vm9, %v1758_v48 }
 0x13f   : > { %1796 = vst.msk [vmem:[%s2548_s20 + $0x1e] sm:$0x3] %vm394_vm9, %v1762_v49  ;;  %1797 = vst.msk [vmem:[%s2548_s20 + $0x2e] sm:$0x3] %vm394_vm9, %v1766_v0 }
 0x140   : > { %1799 = vst.msk [vmem:[%s2548_s20 + $0x4e] sm:$0x3] %vm394_vm9, %v1774_v1  ;;  %1800 = vst.msk [vmem:[%s2548_s20 + $0x5e] sm:$0x3] %vm394_vm9, %v1778_v50 }
 0x141   : > { %1801 = vst.msk [vmem:[%s2548_s20 + $0x6e] sm:$0x3] %vm394_vm9, %v1782_v51  ;;  %1798 = vst.msk [vmem:[%s2548_s20 + $0x3e] sm:$0x3] %vm394_vm9, %v1770_v52 }
 0x142   : > { %1802 = vst.msk [vmem:[%s2548_s20 + $0x7e] sm:$0x3] %vm394_vm9, %v1786_v53 }
 0x143   : > { %2147 = shalt.err (!%p2144_p9)
}
 0x144   : > { %s2148_s6 = scalar_lea.hbm %s2771_s19, 2048  ;;  %s2152_s7 = scalar_lea.hbm %s2841_s2, 4096 }
 0x145   : > { %p2149_p0 = scmp.ne.s32.totalorder %s2771_s19, %s2148_s6  ;;  %p2153_p10 = scmp.lt.s32.totalorder %s2771_s19, %s2841_s2 }
 0x146   : > { %p2154_p11 = scmp.lt.s32.totalorder %s2152_s7, %s2148_s6 }
 0x147   : > { %p2150_p2 = pnand %p2149_p0, %p2853_p13 }
 0x148   : > { %p2155_p4 = por %p2154_p11, %p2153_p10 }
 0x149   : > { %p2151_p6 = pneg %p2150_p2 }
 0x14b   : > { %p2156_p3 = pnand %p2155_p4, %p2151_p6 }
 0x14d   : > { %2159 = shalt.err (!%p2156_p3)
}
 0x14e   : > { %s2228_s18 = smov 128   ;;  %s2229_s20 = smov 8  }
 0x14f   : > { %2006 = dma.vmem_to_hbm [thread:$0]  (%p2853_p13), %s2773_s26, 2048, %s2771_s19, %s1804_s24, %s2228_s18, %s2228_s18, %s2229_s20  }
 0x150 PF: > { %s1834_s23 = sand.u32 1, %s2198_s9   ;;  %p2854_p5 = scmp.ne.s32.totalorder %s2848_s22, 0 }
 0x151   : > { %p2855_p1 = scmp.ge.s32.totalorder %s2218_s14, 2  ;;  %s1835_s12 = scalar_lea.sflag [#allocation4], %s1834_s23 }
 0x153   : > { %p2017_p12 = pnand %p2855_p1, %p2854_p5 }
 0x155   : > { %p2018_p7 = pneg %p2017_p12 }
 0x157   : > { %2193 = dma.done.wait (%p2018_p7), %s1835_s12, 2048  }
 0x158   : > { %2195 = vsyncadd (%p2018_p7), %s1835_s12, 4294965248  ;;  %s19_s14 = sadd.s32 1, %s2218_s14   ;;  %s2856_s9 = smov %s2202_s10 }
 0x159   : > { %p16_p8 = scmp.ge.s32.totalorder %s19_s14, 4   ;;  %s2857_s10 = smov %s2206_s11 }
 0x15a   : > { %s2858_s11 = smov %s2347_s27  ;;  %s2859_s12 = smov %s2214_s13 }
 0x15b   : > { %s2860_s13 = smov %s2862_s28  ;;  %18 = sbr.rel (!%p16_p8) target bundleno = 7 (0x7), region = 78 }
 0x160   :  { %1840 = vsyncpa [#allocation3], 1 }
 0x161   :  { %1842 = vsyncpa [#allocation3 + $0x1], 1 }
 0x162   :  { %1843 = vsyncpa [#allocation6], 1 }
 0x163   :  { %1845 = vsyncpa [#allocation6 + $0x1], 1 }
 0x164   :  { %1846 = vsyncpa [#allocation4], 1 }
 0x165   :  { %1848 = vsyncpa [#allocation4 + $0x1], 1 }

</bundles_post_ra>
